<compile_context>
chip_gen: v6e
topology: v6e:2x2x1
jax: 0.10.0
libtpu: 0.0.40
codegen_flags: <defaults>
</compile_context>

<pallas_src>
import functools

import jax
import jax.numpy as jnp
from jax import lax
from jax.experimental import pallas as pl
from jax.experimental.pallas import tpu as pltpu

LANES = 128


def _triplet_loss_kernel(*refs, num_inputs, inv_t, n_total, block_rows,
                         needs_mask):
    # refs = (x0_ref, x1_ref, ..., x_{K-1}_ref, out_ref, acc_ref)
    in_refs = refs[:num_inputs]
    out_ref = refs[num_inputs]
    acc_ref = refs[num_inputs + 1]

    step = pl.program_id(0)

    @pl.when(step == 0)
    def _init():
        acc_ref[...] = jnp.zeros_like(acc_ref)

    x0 = in_refs[0][...].astype(jnp.float32)

    if needs_mask:
        # Global flat element index of every lane in this tile; lanes >= n_total
        # (host lane-padding or partial last grid block) are masked to
        # contribute exactly 0 to the loss sum.
        row_ids = (lax.broadcasted_iota(jnp.int32, (block_rows, LANES), 0)
                   + step * block_rows)
        col_ids = lax.broadcasted_iota(jnp.int32, (block_rows, LANES), 1)
        mask = (row_ids * LANES + col_ids) < n_total
    else:
        mask = None

    # s = sum_{k>0} exp((x_k - x_0) * inv_t) -- unrolled over K:
    # pure VPU adds over fully packed vregs, K-1 EUP exps per element.
    s = jnp.zeros_like(x0)
    for r in in_refs[1:]:
        d = (r[...].astype(jnp.float32) - x0) * inv_t
        if mask is not None:
            d = jnp.where(mask, d, -1e30)   # exp(-1e30) == 0 -> no contribution
        s = s + jnp.exp(d)

    # per-element -log_softmax; masked lanes give log(1) == 0.
    loss_i = jnp.log(1.0 + s)
    acc_ref[...] += loss_i

    @pl.when(step == pl.num_programs(0) - 1)
    def _finalize():
        # Single cross-lane reduce + scalar write, only once.
        out_ref[0, 0] = jnp.sum(acc_ref[...]) * (1.0 / n_total)


def triplet_loss(dots, temperature: float = 1.0, tile_rows: int = 1024):
    """dots: tuple/list of same-shaped arrays. Returns scalar float32 loss."""
    K = len(dots)
    N = int(dots[0].size)

    # Lane-dense 2-D slabs: (rows, 128) per input, native dtype (cast in-kernel).
    rows = pl.cdiv(N, LANES)
    n_pad = rows * LANES
    slabs = []
    for d in dots:
        f = jnp.ravel(d)
        if n_pad != N:
            f = jnp.pad(f, (0, n_pad - N))   # pad value irrelevant (masked)
        slabs.append(f.reshape(rows, LANES))

    # Block rows: full array if small, else a sublane-aligned tile.
    if rows <= tile_rows:
        block_rows = rows
    else:
        block_rows = max(8, (tile_rows // 8) * 8)
    num_tiles = pl.cdiv(rows, block_rows)
    needs_mask = (n_pad != N) or (rows % block_rows != 0)

    kernel = functools.partial(
        _triplet_loss_kernel,
        num_inputs=K,
        inv_t=float(1.0 / temperature),
        n_total=N,
        block_rows=block_rows,
        needs_mask=needs_mask,
    )

    in_specs = [
        pl.BlockSpec((block_rows, LANES), lambda i: (i, 0)) for _ in range(K)
    ]

    out = pl.pallas_call(
        kernel,
        out_shape=jax.ShapeDtypeStruct((1, 1), jnp.float32),
        grid=(num_tiles,),
        in_specs=in_specs,
        out_specs=pl.BlockSpec(memory_space=pltpu.SMEM),
        scratch_shapes=[pltpu.VMEM((block_rows, LANES), jnp.float32)],
        compiler_params=pltpu.CompilerParams(
            dimension_semantics=("arbitrary",)),
    )(*slabs)
    return out[0, 0]


def _reference(dots, temperature=1.0):
    # Pure-JAX mirror of the PyTorch module (un-stabilized logsumexp).
    x = jnp.stack([jnp.ravel(d).astype(jnp.float32) for d in dots], 0)
    x = x / temperature
    lse = jnp.log(jnp.sum(jnp.exp(x), axis=0))
    return jnp.mean(-(x[0] - lse))


if __name__ == "__main__":
    key = jax.random.PRNGKey(0)
    k1, k2, k3 = jax.random.split(key, 3)

    # 3 score tensors (anchor*positive and two anchor*negative similarity
    # maps). N = 8*136 = 1088 is deliberately NOT a multiple of 128 so the
    # lane-padding / masking path is exercised; tile_rows=8 forces a 2-step
    # grid with a partial last tile.
    shape = (8, 136)
    temperature = 0.7
    dots = (
        jax.random.normal(k1, shape, dtype=jnp.float32),
        jax.random.normal(k2, shape, dtype=jnp.float32),
        jax.random.normal(k3, shape, dtype=jnp.float32),
    )

    loss = triplet_loss(dots, temperature=temperature, tile_rows=8)
    loss = jax.block_until_ready(loss)
    ref = _reference(dots, temperature=temperature)
    assert jnp.allclose(loss, ref, rtol=1e-5, atol=1e-5), (loss, ref)

    # Single-tile / no-mask path: N an exact multiple of 128.
    shape2 = (2, 128)
    dots2 = (
        jax.random.normal(k1, shape2, dtype=jnp.float32),
        jax.random.normal(k2, shape2, dtype=jnp.float32),
        jax.random.normal(k3, shape2, dtype=jnp.float32),
    )
    loss2 = jax.block_until_ready(triplet_loss(dots2, temperature=1.0))
    ref2 = _reference(dots2, temperature=1.0)
    assert jnp.allclose(loss2, ref2, rtol=1e-5, atol=1e-5), (loss2, ref2)

    print("KERNEL_OK")
</pallas_src>

<mosaic_0001>
module attributes {stable_mosaic.version = 11 : i64} {
  func.func @_triplet_loss_kernel(%arg0: i32, %arg1: memref<8x128xf32, #tpu.memory_space<vmem>>, %arg2: memref<8x128xf32, #tpu.memory_space<vmem>>, %arg3: memref<8x128xf32, #tpu.memory_space<vmem>>, %arg4: memref<1x1xf32, #tpu.memory_space<smem>>, %arg5: memref<8x128xf32, #tpu.memory_space<vmem>>) attributes {dimension_semantics = [#tpu.dimension_semantics<arbitrary>], iteration_bounds = array<i64: 2>, scalar_prefetch = 0 : i64, scratch_operands = 1 : i64, tpu.core_type = #tpu.core_type<tc>, window_params = [{transform_indices = @transform_0, window_bounds = array<i64: 8, 128>}, {transform_indices = @transform_1, window_bounds = array<i64: 8, 128>}, {transform_indices = @transform_2, window_bounds = array<i64: 8, 128>}, {transform_indices = @transform_3, window_bounds = array<i64: 1, 1>}]} {
    %c0_i32 = arith.constant 0 : i32
    %0 = arith.cmpi eq, %arg0, %c0_i32 : i32
    %1 = arith.extui %0 : i1 to i32
    %c0_i32_0 = arith.constant 0 : i32
    %2 = arith.cmpi ne, %1, %c0_i32_0 : i32
    scf.if %2 {
      %cst_16 = arith.constant 0.000000e+00 : f32
      %40 = vector.broadcast %cst_16 : f32 to vector<8x128xf32>
      %c0_17 = arith.constant 0 : index
      %c0_18 = arith.constant 0 : index
      %41 = vector.load %arg5[%c0_17, %c0_18] : memref<8x128xf32, #tpu.memory_space<vmem>>, vector<8x128xf32>
      tpu.vector_store %arg5[%c0_17, %c0_18], %40 {strides = array<i32>} : memref<8x128xf32, #tpu.memory_space<vmem>>, vector<8x128xf32>,
    } else {
    }
    %c0 = arith.constant 0 : index
    %c0_1 = arith.constant 0 : index
    %3 = vector.load %arg1[%c0, %c0_1] : memref<8x128xf32, #tpu.memory_space<vmem>>, vector<8x128xf32>
    %4 = tpu.iota {dimensions = array<i32: 0>} : vector<8x128xi32>
    %c8_i32 = arith.constant 8 : i32
    %5 = arith.muli %arg0, %c8_i32 : i32
    %6 = vector.broadcast %5 : i32 to vector<8x128xi32>
    %7 = arith.addi %4, %6 : vector<8x128xi32>
    %8 = tpu.iota {dimensions = array<i32: 1>} : vector<8x128xi32>
    %c128_i32 = arith.constant 128 : i32
    %9 = vector.broadcast %c128_i32 : i32 to vector<8x128xi32>
    %10 = arith.muli %7, %9 : vector<8x128xi32>
    %11 = arith.addi %10, %8 : vector<8x128xi32>
    %c1088_i32 = arith.constant 1088 : i32
    %12 = vector.broadcast %c1088_i32 : i32 to vector<8x128xi32>
    %13 = arith.cmpi slt, %11, %12 : vector<8x128xi32>
    %cst = arith.constant 0.000000e+00 : f32
    %14 = vector.broadcast %cst : f32 to vector<8x128xf32>
    %c0_2 = arith.constant 0 : index
    %c0_3 = arith.constant 0 : index
    %15 = vector.load %arg2[%c0_2, %c0_3] : memref<8x128xf32, #tpu.memory_space<vmem>>, vector<8x128xf32>
    %16 = arith.subf %15, %3 : vector<8x128xf32>
    %cst_4 = arith.constant 1.42857146 : f32
    %17 = vector.broadcast %cst_4 : f32 to vector<8x128xf32>
    %18 = arith.mulf %16, %17 : vector<8x128xf32>
    %cst_5 = arith.constant -1.000000e+30 : f32
    %19 = vector.broadcast %cst_5 : f32 to vector<8x128xf32>
    %20 = arith.select %13, %18, %19 : vector<8x128xi1>, vector<8x128xf32>
    %21 = math.exp %20 : vector<8x128xf32>
    %22 = arith.addf %14, %21 : vector<8x128xf32>
    %c0_6 = arith.constant 0 : index
    %c0_7 = arith.constant 0 : index
    %23 = vector.load %arg3[%c0_6, %c0_7] : memref<8x128xf32, #tpu.memory_space<vmem>>, vector<8x128xf32>
    %24 = arith.subf %23, %3 : vector<8x128xf32>
    %cst_8 = arith.constant 1.42857146 : f32
    %25 = vector.broadcast %cst_8 : f32 to vector<8x128xf32>
    %26 = arith.mulf %24, %25 : vector<8x128xf32>
    %cst_9 = arith.constant -1.000000e+30 : f32
    %27 = vector.broadcast %cst_9 : f32 to vector<8x128xf32>
    %28 = arith.select %13, %26, %27 : vector<8x128xi1>, vector<8x128xf32>
    %29 = math.exp %28 : vector<8x128xf32>
    %30 = arith.addf %22, %29 : vector<8x128xf32>
    %cst_10 = arith.constant 1.000000e+00 : f32
    %31 = vector.broadcast %cst_10 : f32 to vector<8x128xf32>
    %32 = arith.addf %31, %30 : vector<8x128xf32>
    %33 = math.log %32 : vector<8x128xf32>
    %c0_11 = arith.constant 0 : index
    %c0_12 = arith.constant 0 : index
    %34 = vector.load %arg5[%c0_11, %c0_12] : memref<8x128xf32, #tpu.memory_space<vmem>>, vector<8x128xf32>
    %35 = arith.addf %34, %33 : vector<8x128xf32>
    %c0_13 = arith.constant 0 : index
    %c0_14 = arith.constant 0 : index
    %36 = vector.load %arg5[%c0_13, %c0_14] : memref<8x128xf32, #tpu.memory_space<vmem>>, vector<8x128xf32>
    tpu.vector_store %arg5[%c0_13, %c0_14], %35 {strides = array<i32>} : memref<8x128xf32, #tpu.memory_space<vmem>>, vector<8x128xf32>,
    %c1_i32 = arith.constant 1 : i32
    %37 = arith.cmpi eq, %arg0, %c1_i32 : i32
    %38 = arith.extui %37 : i1 to i32
    %c0_i32_15 = arith.constant 0 : i32
    %39 = arith.cmpi ne, %38, %c0_i32_15 : i32
    scf.if %39 {
      %c0_16 = arith.constant 0 : index
      %c0_17 = arith.constant 0 : index
      %40 = vector.load %arg5[%c0_16, %c0_17] : memref<8x128xf32, #tpu.memory_space<vmem>>, vector<8x128xf32>
      %41 = vector.shape_cast %40 : vector<8x128xf32> to vector<1x8x128xf32>
      %cst_18 = arith.constant dense<0.000000e+00> : vector<1xf32>
      %42 = vector.multi_reduction <add>, %41, %cst_18 [1, 2] : vector<1x8x128xf32> to vector<1xf32>
      %43 = vector.shape_cast %42 : vector<1xf32> to vector<1x1x1xf32>
      %44 = vector.extract %43[0, 0, 0] : f32 from vector<1x1x1xf32>
      %cst_19 = arith.constant 9.1911765E-4 : f32
      %45 = arith.mulf %44, %cst_19 : f32
      %c0_20 = arith.constant 0 : index
      %c0_21 = arith.constant 0 : index
      %46 = memref.load %arg4[%c0_20, %c0_21] : memref<1x1xf32, #tpu.memory_space<smem>>
      memref.store %45, %arg4[%c0_20, %c0_21] : memref<1x1xf32, #tpu.memory_space<smem>>
    } else {
    }
    return
  }
  func.func @transform_0(%arg0: i32) -> (i32, i32) {
    %c0_i32 = arith.constant 0 : i32
    %c0_i32_0 = arith.constant 0 : i32
    return %arg0, %c0_i32 : i32, i32
  }
  func.func @transform_1(%arg0: i32) -> (i32, i32) {
    %c0_i32 = arith.constant 0 : i32
    %c0_i32_0 = arith.constant 0 : i32
    return %arg0, %c0_i32 : i32, i32
  }
  func.func @transform_2(%arg0: i32) -> (i32, i32) {
    %c0_i32 = arith.constant 0 : i32
    %c0_i32_0 = arith.constant 0 : i32
    return %arg0, %c0_i32 : i32, i32
  }
  func.func @transform_3(%arg0: i32) -> (i32, i32) {
    %c0_i32 = arith.constant 0 : i32
    %c0_i32_0 = arith.constant 0 : i32
    %c0_i32_1 = arith.constant 0 : i32
    return %c0_i32, %c0_i32_0 : i32, i32
  }
}

</mosaic_0001>

<bundles_post_ra>
// kernel: tpu_custom_call.1
= control target key start
LH: loop header
LB: loop body
LE: loop exit
PB: predicated region body
PF: predicated region fallthrough
CT: control target
= control target key end

     0   :  { %8 = vsyncpa [#allocation4], 0  ;;  %s821_s0 = inlined_call_operand.hbm [shape: f32[9,128], index: 0, kind: input, shape index: {}]   ;;  %s822_s1 = inlined_call_operand.hbm [shape: f32[9,128], index: 1, kind: input, shape index: {}]   ;;  %s823_s2 = inlined_call_operand.hbm [shape: f32[9,128], index: 2, kind: input, shape index: {}]   ;;  %s824_s3 = inlined_call_operand.hbm [shape: f32[1,1], index: 3, kind: output, shape index: {}]  }
   0x1   :  { %10 = vsyncpa [#allocation4 + $0x1], 0 }
   0x2   :  { %11 = vsyncpa [#allocation7], 0 }
   0x3   :  { %13 = vsyncpa [#allocation7 + $0x1], 0 }
   0x4   :  { %14 = vsyncpa [#allocation5], 0  ;;  %s645_s12 = smov 0   ;;  %s647_s13 = smov 0  }
   0x5   :  { %s649_s14 = smov 0   ;;  %s651_s15 = smov 0  }
   0x6 LB: > { %s664_s16 = sadd.s32 4294967295, %s618_s15   ;;  %s667_s17 = sadd.s32 1, %s618_s15   ;;  %s618_s15 = sphi %s651_s15, %s837_s15   ;;  %s614_s14 = sphi %s649_s14, %s836_s14   ;;  %s610_s13 = sphi %s647_s13, %s835_s13   ;;  %s606_s12 = sphi %s645_s12, %s834_s12  }
   0x7   : > { %s24_s18 = ssub.s32 %s618_s15, %s667_s17  ;;  %s27_s19 = sadd.s32 1, %s614_s14 }
   0x8   : > { %p25_p0 = scmp.eq.s32.totalorder %s24_s18, 0  ;;  %p34_p1 = scmp.ne.s32.totalorder %s614_s14, %s610_s13 }
   0x9   : > { %p35_p2 = scmp.eq.s32.totalorder %s618_s15, 0  ;;  %p40_p3 = scmp.ne.s32.totalorder %s610_s13, %s606_s12 }
   0xa   : > { %s677_s20 = scalar_select %p25_p0, %s614_s14, %s27_s19  }
   0xb   : > { %p36_p4 = por %p35_p2, %p34_p1  ;;  %p41_p5 = scmp.eq.s32.totalorder %s664_s16, 0 }
   0xc   : > { %p439_p6 = scmp.lt.s32.totalorder %s618_s15, 2  ;;  %s137_s22 = sand.u32 1, %s614_s14  }
   0xd   : > { %p681_p7 = por %p41_p5, %p40_p3  ;;  %s688_s23 = sshll.u32 %s137_s22, 3 }
   0xe   : > { %s691_s24 = sshll.u32 %s618_s15, 7  ;;  %p693_p8 = pnand %p439_p6, %p36_p4 }
   0xf   : > { %s826_s21 = scalar_select %p681_p7, 1, 0 }
  0x10   : > { %s155_s26 = sand.u32 1, %s618_s15   ;;  %s702_s29 = scalar_lea.hbm %s822_s1, %s691_s24 }
  0x11   : > { %s159_s30 = scalar_lea.vmem [#allocation6], %s688_s23  ;;  %s707_s5 = scalar_lea.sflag [#allocation7], %s155_s26 }
  0x12   : > { %s166_s4 = sshll.u32 %s159_s30, 4  ;;  %s482_s6 = scalar_lea.hbm %s702_s29, 128  ;;  %s167_s4 = int_to_ptr.vmem [resolvable:$true] %s166_s4 }
  0x13   : > { %p483_p11 = scmp.ne.s32.totalorder %s702_s29, %s482_s6  ;;  %p713_p12 = pneg %p693_p8 }
  0x14   : > { %s487_s10 = scalar_lea.hbm %s822_s1, 256  ;;  %p488_p1 = scmp.lt.s32.totalorder %s702_s29, %s822_s1 }
  0x15   : > { %p485_p13 = pnand %p713_p12, %p483_p11  ;;  %p489_p2 = scmp.lt.s32.totalorder %s487_s10, %s482_s6 }
  0x17   : > { %p486_p0 = pneg %p485_p13  ;;  %p490_p3 = por %p489_p2, %p488_p1 }
  0x19   : > { %p491_p4 = pnand %p490_p3, %p486_p0 }
  0x1b   : > { %494 = shalt.err (!%p491_p4)
}
  0x1c   : > { %s495_s18 = scalar_lea.vmem %s167_s4, 128  ;;  %s620_s19 = smov [#allocation6]  }
  0x1d   : > { %p496_p5 = scmp.ne.s32.totalorder %s167_s4, %s495_s18  ;;  %s500_s26 = sshll.u32 %s620_s19, 4  ;;  %s501_s26 = int_to_ptr.vmem [resolvable:$false] %s500_s26 }
  0x1e   : > { %s502_s27 = scalar_lea.vmem %s501_s26, 256  ;;  %p503_p11 = scmp.lt.s32.totalorder %s167_s4, %s501_s26 }
  0x1f   : > { %p498_p6 = pnand %p496_p5, %p713_p12  ;;  %p504_p13 = scmp.lt.s32.totalorder %s502_s27, %s495_s18 }
  0x21   : > { %p499_p9 = pneg %p498_p6  ;;  %p505_p10 = por %p504_p13, %p503_p11 }
  0x23   : > { %p506_p7 = pnand %p505_p10, %p499_p9 }
  0x25   : > { %509 = shalt.err (!%p506_p7)
}
  0x26   : > { %435 = dma.hbm_to_vmem [thread:$0]  (!%p693_p8), %s702_s29, 128, %s167_s4, %s707_s5  }
  0x27   : > { %p829_p0 = scmp.lt.s32.totalorder %s618_s15, 3  ;;  %p830_p1 = scmp.ge.s32.totalorder %s618_s15, 1 }
  0x28   : > { %s744_s8 = scalar_lea.hbm %s821_s0, %s691_s24  ;;  %s141_s9 = scalar_lea.vmem [#allocation3], %s688_s23 }
  0x29   : > { %p736_p2 = pnand %p830_p1, %p829_p0  ;;  %s148_s10 = sshll.u32 %s141_s9, 4  ;;  %s149_s10 = int_to_ptr.vmem [resolvable:$true] %s148_s10 }
  0x2a   : > { %s751_s29 = scalar_lea.hbm %s823_s2, %s691_s24  ;;  %s138_s15 = scalar_lea.sflag [#allocation4], %s137_s22 }
  0x2b   : > { %s831_s28 = scalar_select %p736_p2, 1, 0 }
  0x2c   : > { %s510_s4 = scalar_lea.hbm %s744_s8, 128  ;;  %s515_s26 = scalar_lea.hbm %s821_s0, 256 }
  0x2d   : > { %p511_p7 = scmp.ne.s32.totalorder %s744_s8, %s510_s4  ;;  %p516_p3 = scmp.lt.s32.totalorder %s744_s8, %s821_s0 }
  0x2e   : > { %p517_p4 = scmp.lt.s32.totalorder %s515_s26, %s510_s4 }
  0x2f   : > { %p513_p9 = pnand %p511_p7, %p713_p12 }
  0x30   : > { %p518_p5 = por %p517_p4, %p516_p3 }
  0x31   : > { %p514_p10 = pneg %p513_p9 }
  0x33   : > { %p519_p6 = pnand %p518_p5, %p514_p10 }
  0x35   : > { %522 = shalt.err (!%p519_p6)
}
  0x36   : > { %s523_s24 = scalar_lea.vmem %s149_s10, 128  ;;  %s621_s22 = smov [#allocation3]  }
  0x37   : > { %p524_p11 = scmp.ne.s32.totalorder %s149_s10, %s523_s24  ;;  %s528_s6 = sshll.u32 %s621_s22, 4  ;;  %s529_s6 = int_to_ptr.vmem [resolvable:$false] %s528_s6 }
  0x38   : > { %s530_s9 = scalar_lea.vmem %s529_s6, 256  ;;  %p531_p1 = scmp.lt.s32.totalorder %s149_s10, %s529_s6 }
  0x39   : > { %p526_p13 = pnand %p524_p11, %p713_p12  ;;  %p532_p7 = scmp.lt.s32.totalorder %s530_s9, %s523_s24 }
  0x3b   : > { %p527_p0 = pneg %p526_p13  ;;  %p533_p9 = por %p532_p7, %p531_p1 }
  0x3d   : > { %p534_p2 = pnand %p533_p9, %p527_p0 }
  0x3f   : > { %537 = shalt.err (!%p534_p2)
}
  0x40   : > { %432 = dma.hbm_to_vmem [thread:$0]  (!%p693_p8), %s744_s8, 128, %s149_s10, %s138_s15  }
  0x41   : > { %s177_s11 = scalar_lea.vmem [#allocation8], %s688_s23  ;;  %s538_s4 = scalar_lea.hbm %s751_s29, 128 }
  0x42   : > { %s184_s12 = sshll.u32 %s177_s11, 4  ;;  %p539_p10 = scmp.ne.s32.totalorder %s751_s29, %s538_s4  ;;  %s185_s12 = int_to_ptr.vmem [resolvable:$true] %s184_s12 }
  0x43   : > { %s543_s26 = scalar_lea.hbm %s823_s2, 256  ;;  %p544_p2 = scmp.lt.s32.totalorder %s751_s29, %s823_s2 }
  0x44   : > { %p541_p3 = pnand %p539_p10, %p713_p12  ;;  %p545_p5 = scmp.lt.s32.totalorder %s543_s26, %s538_s4 }
  0x46   : > { %p542_p4 = pneg %p541_p3  ;;  %p546_p6 = por %p545_p5, %p544_p2 }
  0x48   : > { %p547_p11 = pnand %p546_p6, %p542_p4 }
  0x4a   : > { %550 = shalt.err (!%p547_p11)
}
  0x4b   : > { %s551_s23 = scalar_lea.vmem %s185_s12, 128  ;;  %s622_s8 = smov [#allocation8]  }
  0x4c   : > { %p552_p13 = scmp.ne.s32.totalorder %s185_s12, %s551_s23  ;;  %s556_s10 = sshll.u32 %s622_s8, 4  ;;  %s557_s10 = int_to_ptr.vmem [resolvable:$false] %s556_s10 }
  0x4d   : > { %s558_s15 = scalar_lea.vmem %s557_s10, 256  ;;  %p559_p7 = scmp.lt.s32.totalorder %s185_s12, %s557_s10 }
  0x4e   : > { %p554_p0 = pnand %p552_p13, %p713_p12  ;;  %p560_p9 = scmp.lt.s32.totalorder %s558_s15, %s551_s23 }
  0x50   : > { %p555_p1 = pneg %p554_p0  ;;  %p561_p10 = por %p560_p9, %p559_p7 }
  0x52   : > { %p562_p3 = pnand %p561_p10, %p555_p1 }
  0x54   : > { %565 = shalt.err (!%p562_p3)
}
  0x55   : > { %438 = dma.hbm_to_vmem [thread:$0]  (!%p693_p8), %s751_s29, 128, %s185_s12, %s707_s5  }
  0x56   : > { %p832_p4 = scmp.ne.s32.totalorder %s831_s28, 0 }
  0x57   : > { %s195_s7 = sand.u32 (!%p832_p4), 1, %s610_s13   ;;  %p833_p12 = scmp.ne.s32.totalorder (!%p832_p4), %s826_s21, 0 }
  0x58   : > { %193 = sbr.rel (%p832_p4) target bundleno = 374 (0x176), region = 32  ;;  %s407_s24 = sshll.u32 (!%p832_p4), %s195_s7, 3 }
  0x59   : > { %s196_s22 = scalar_lea.sflag (!%p832_p4), [#allocation4], %s195_s7  ;;  %s199_s6 = scalar_lea.vmem (!%p832_p4), [#allocation3], %s407_s24 }
  0x5d   : > { %593 = dma.done.wait (%p833_p12), %s196_s22, 128  }
  0x5e   : > { %595 = vsyncadd (%p833_p12), %s196_s22, 4294967168  ;;  %s204_s25 = sand.u32 1, %s664_s16   ;;  %s208_s11 = scalar_lea.vmem [#allocation6], %s407_s24 }
  0x5f   : > { %s205_s9 = scalar_lea.sflag [#allocation7], %s204_s25 }
  0x60   : > { %597 = dma.done.wait (%p833_p12), %s205_s9, 256  }
  0x61   : > { %599 = vsyncadd (%p833_p12), %s205_s9, 4294967040  ;;  %s217_s5 = scalar_lea.vmem [#allocation8], %s407_s24  ;;  %p410_p8 = scmp.ne.s32.totalorder %s664_s16, 0 }
  0x63   : > { %248 = sbr.rel (%p410_p8) target bundleno = 106 (0x6a), region = 48 }
  0x68   : > { %v623_v0 = vmov 0.0  }
  0x69   : > { %249 = vst [vmem:[#allocation2] sm:$0xff] %v623_v0 }
  0x6a PF: > { %v250_v1 = vld [vmem:[%s199_s6] sm:$0xff]  ;;  %v251_v2 = vlaneseq  ;;  %s411_s28 = sshll.u32 %s664_s16, 3  ;;  %v261_v3 = vld [vmem:[%s208_s11] sm:$0xff]  ;;  %p412_p2 = scmp.ne.s32.totalorder %s664_s16, 1 }
  0x6b   : > { %v268_v4 = vld [vmem:[%s217_s5] sm:$0xff]  ;;  %v254_v5 = vstv %s411_s28  ;;  %v262_v7 = vsub.f32 %v261_v3, %v250_v1 }
  0x6c   : > { %v252_v6 = vshrl.u32 %v251_v2, 7  ;;  %v269_v8 = vsub.f32 %v268_v4, %v250_v1  ;;  %v257_v10 = vand.u32 127, %v251_v2 }
  0x6d   : > { %v263_v12 = vmul.f32 1.4285715, %v262_v7 }
  0x6e   : > { %v255_v9 = vadd.s32 %v254_v5, %v252_v6  ;;  %v270_v13 = vmul.f32 1.4285715, %v269_v8 }
  0x70   : > { %v258_v11 = vmul.u32 128, %v255_v9  ;;  %v278_v24 = vld [vmem:[#allocation2] sm:$0xff] }
  0x72   : > { %v259_v14 = vadd.s32 %v258_v11, %v257_v10 }
  0x74   : > { %vm260_vm0 = vcmp.lt.s32.totalorder %v259_v14, 1088 }
  0x75   : > { %v264_v15 = vsel %vm260_vm0, %v263_v12, -1e+30  ;;  %v271_v16 = vsel %vm260_vm0, %v270_v13, -1e+30 }
  0x76   : > { %v265_v17 = vmul.f32 1.442695, %v264_v15  ;;  %v272_v18 = vmul.f32 1.442695, %v271_v16 }
  0x78   : > { %476 = vpow2.f32 %v265_v17 }
  0x79   : > { %478 = vpow2.f32 %v272_v18 }
  0x85   : > { %v477_v19 = vpop.eup %476 }
  0x86   : > { %v479_v20 = vpop.eup %478 }
  0x87   : > { %v274_v21 = vadd.f32 %v479_v20, %v477_v19 }
  0x89   : > { %v275_v22 = vadd.f32 1.0, %v274_v21 }
  0x8b   : > { %480 = vlog2.f32 %v275_v22 }
  0x98   : > { %v481_v23 = vpop.eup %480 }
  0x99   : > { %v277_v25 = vmul.f32 0.6931472, %v481_v23  ;;  %284 = sbr.rel (%p412_p2) target bundleno = 368 (0x170), region = 52 }
  0x9b   : > { %v279_v26 = vadd.f32 %v278_v24, %v277_v25 }
  0x9d   : > { %280 = vst [vmem:[#allocation2] sm:$0xff] %v279_v26 }
  0xa4   : > { %v285_v27 = vld [vmem:[#allocation2] sm:$0xff] }
  0xa5   : > { %286 = vadd.xlane.f32.xlu0 %v285_v27 }
 0x12e   : > { %v287_v28 = vpop.xlane.xlu0 %286 }
 0x12f   : > { %v288_v29 = vrot.slane %v287_v28, 4 }
 0x131   : > { %v289_v30 = vadd.f32 %v288_v29, %v287_v28 }
 0x133   : > { %v290_v31 = vrot.slane %v289_v30, 2 }
 0x135   : > { %v291_v32 = vadd.f32 %v290_v31, %v289_v30 }
 0x137   : > { %v292_v33 = vrot.slane %v291_v32, 1 }
 0x139   : > { %v293_v34 = vadd.f32 %v292_v33, %v291_v32 }
 0x13b   : > { %417 = vpush %v293_v34 }
 0x16c   : > { %s418_s21 = spop %417 }
 0x16d   : > { %s295_s29 = smul.f32 0.00091911765, %s418_s21 }
 0x16f   : > { %297 = sst [smem:[#allocation9]] %s295_s29 }
 0x170 PF: > { %p440_p5 = scmp.eq.s32.totalorder %s664_s16, 1  ;;  %s624_s12 = smov [#allocation9]  }
 0x172   : > { %426 = dma.smem_to_hbm (%p440_p5), %s624_s12, 16, %s824_s3, [#allocation5]  }
 0x173   : > { %601 = dma.done.wait (%p440_p5), [#allocation5], 16  }
 0x174   : > { %603 = vsyncadd (%p440_p5), [#allocation5], 4294967280 }
 0x175   : > { %311 = sfence }
 0x176 PF: > { %p17_p6 = scmp.ge.s32.totalorder %s667_s17, 4   ;;  %s834_s12 = smov %s610_s13 }
 0x177   : > { %s835_s13 = smov %s614_s14  ;;  %s836_s14 = smov %s677_s20 }
 0x178   : > { %s837_s15 = smov %s667_s17  ;;  %19 = sbr.rel (!%p17_p6) target bundleno = 6 (0x6), region = 102 }
 0x17d   :  { %317 = vsyncpa [#allocation4], 1 }
 0x17e   :  { %319 = vsyncpa [#allocation4 + $0x1], 1 }
 0x17f   :  { %320 = vsyncpa [#allocation7], 1 }
 0x180   :  { %322 = vsyncpa [#allocation7 + $0x1], 1 }
 0x181   :  { %323 = vsyncpa [#allocation5], 1 }
 0x182   :  { %325 = vsyncpa [#allocation5 + $0x1], 1 }

</bundles_post_ra>
